<compile_context>
chip_gen: v7x
topology: tpu7x:2x2x1
jax: 0.10.0
libtpu: 0.0.40
codegen_flags: <defaults>
</compile_context>

<pallas_src>
import functools

import jax
import jax.numpy as jnp
from jax.experimental import pallas as pl
from jax.experimental.pallas import tpu as pltpu


def _actor_kernel(x_ref, w1_ref, b1_ref, w2_ref, b2_ref, w3_ref, b3_ref,
                  o_ref, *, max_action):
    mxu_dtype = w1_ref.dtype
    # f32 path: force full-precision MXU passes; bf16 path: native single pass.
    prec = jax.lax.Precision.HIGHEST if mxu_dtype == jnp.float32 else None

    x = x_ref[...].astype(mxu_dtype)          # no-op when already f32

    # Layer 1: Linear + ReLU (MXU matmul, f32 accumulate, f32 bias/ReLU).
    h = jnp.dot(x, w1_ref[...], preferred_element_type=jnp.float32,
                precision=prec)
    h = jnp.maximum(h + b1_ref[...], 0.0)

    # Layer 2: Linear + ReLU.
    h = jnp.dot(h.astype(mxu_dtype), w2_ref[...],
                preferred_element_type=jnp.float32, precision=prec)
    h = jnp.maximum(h + b2_ref[...], 0.0)

    # Layer 3: Linear + Tanh (EUP), optionally scaled by max_action.
    h = jnp.dot(h.astype(mxu_dtype), w3_ref[...],
                preferred_element_type=jnp.float32, precision=prec)
    out = jnp.tanh(h + b3_ref[...])
    if max_action != 1.0:          # static Python float -> folded at trace time
        out = max_action * out
    o_ref[...] = out.astype(o_ref.dtype)


def _auto_bf16():
    """bf16 MXU inputs on v6e/v7x (fast bf16 MXU, halved weight DMA/VMEM);
    f32 on v5e/v4 where the dtype shuffle is extra VPU work for little gain."""
    try:
        kind = jax.devices()[0].device_kind.lower()
        return ("v6" in kind) or ("v7" in kind)
    except Exception:
        return False


def _vmem_limit_bytes(block_b, n_states, hidden_dim, n_actions, w_itemsize,
                      resident_bufs):
    # VMEM-resident weights + biases (x buffer count).
    resident = resident_bufs * (
        (n_states * hidden_dim + hidden_dim * hidden_dim
         + hidden_dim * n_actions) * w_itemsize
        + (2 * hidden_dim + n_actions) * 4)
    # Streamed state / output tiles, double-buffered by the pipeline.
    streamed = 2 * block_b * (n_states + n_actions) * 4
    # Live f32 intermediates inside the kernel body (h, cast copies, out).
    interm = 4 * block_b * hidden_dim * 4
    need = resident + streamed + interm
    # Never below the v6e/v7x default scoped limit; cap at the 128 MiB
    # physical VMEM of v5e/v6e (v7x large-hidden cases need K-tiling anyway).
    return int(min(max(32 << 20, 2 * need), 128 << 20))


def actor_forward(state, params, max_action=1.0, *, block_b=512, use_bf16=None):
    """state: (B, n_states) f32.  params: dict of w1,b1,w2,b2,w3,b3 (f32).

    block_b: batch tile for the gridded path.  Keep it a multiple of 8
    (ideally of 256 for the v6e/v7x MXU); big tiles amortize the ~0.35 us
    per-grid-step overhead of this memory-/overhead-bound MLP.
    """
    if use_bf16 is None:
        use_bf16 = _auto_bf16()

    w1, b1 = params["w1"], params["b1"]
    w2, b2 = params["w2"], params["b2"]
    w3, b3 = params["w3"], params["b3"]
    if use_bf16:
        # Cast ONCE in the wrapper (better yet: store params in bf16) so the
        # kernel never re-casts VMEM-resident weights on the VPU each grid
        # step, and their HBM->VMEM DMA / VMEM residency is halved.
        w1 = w1.astype(jnp.bfloat16)
        w2 = w2.astype(jnp.bfloat16)
        w3 = w3.astype(jnp.bfloat16)

    B, n_states = state.shape
    hidden_dim = w1.shape[1]
    n_actions = w3.shape[1]
    kernel = functools.partial(_actor_kernel, max_action=float(max_action))

    flops = 2 * B * (n_states * hidden_dim + hidden_dim * hidden_dim
                     + hidden_dim * n_actions)
    param_bytes = (w1.size * w1.dtype.itemsize + w2.size * w2.dtype.itemsize
                   + w3.size * w3.dtype.itemsize
                   + (b1.size + b2.size + b3.size) * 4)
    cost = pl.CostEstimate(
        flops=flops,
        transcendentals=B * n_actions,
        bytes_accessed=param_bytes + (state.size + B * n_actions) * 4)

    args = (state, w1, b1, w2, b2, w3, b3)

    if B <= block_b:
        # ---- Small batch: single gridless invocation, everything pinned in
        # VMEM (no pipeline loop, no per-step overhead).  Dominated by weight
        # DMA + launch, not compute: if called repeatedly, batch the states
        # across calls instead of micro-optimizing this path.
        vmem = pl.BlockSpec(memory_space=pltpu.MemorySpace.VMEM)
        return pl.pallas_call(
            kernel,
            out_shape=jax.ShapeDtypeStruct((B, n_actions), jnp.float32),
            in_specs=[vmem] * 7,
            out_specs=vmem,
            cost_estimate=cost,
            compiler_params=pltpu.CompilerParams(
                vmem_limit_bytes=_vmem_limit_bytes(
                    B, n_states, hidden_dim, n_actions, w1.dtype.itemsize, 1)),
        )(*args)

    # ---- Large batch: tile over batch only.  No padding: Pallas masks the
    # ragged last tile's writeback, and the garbage rows it reads never mix
    # across rows (no batch-dim reduction in the kernel).
    # TODO(synk): if hidden_dim grows into the thousands, switch to a K-tiled
    # matmul with an f32 VMEM accumulator (w2 alone would dominate VMEM).
    num_tiles = pl.cdiv(B, block_b)

    def run(single_buffer_residents):
        if single_buffer_residents:
            # Constant-index residents do not need double buffering.
            resident = lambda shape: pl.BlockSpec(
                shape, lambda i: (0, 0), pipeline_mode=pl.Buffered(1))
            bufs = 1
        else:
            resident = lambda shape: pl.BlockSpec(shape, lambda i: (0, 0))
            bufs = 2
        return pl.pallas_call(
            kernel,
            out_shape=jax.ShapeDtypeStruct((B, n_actions), jnp.float32),
            grid=(num_tiles,),
            in_specs=[
                pl.BlockSpec((block_b, n_states), lambda i: (i, 0)),  # streamed
                resident((n_states, hidden_dim)),
                resident((1, hidden_dim)),
                resident((hidden_dim, hidden_dim)),
                resident((1, hidden_dim)),
                resident((hidden_dim, n_actions)),
                resident((1, n_actions)),
            ],
            # TODO(synk): n_actions < 128 means masked partial stores; padding
            # the action dim to 128 (or packing outputs) is the biggest
            # remaining lever if the downstream consumer can take it.
            out_specs=pl.BlockSpec((block_b, n_actions), lambda i: (i, 0)),
            cost_estimate=cost,
            compiler_params=pltpu.CompilerParams(
                # TODO(synk): on v7x verify "parallel" actually shards grid
                # steps across both TensorCores; else use pltpu.CORE_PARALLEL.
                dimension_semantics=("parallel",),
                vmem_limit_bytes=_vmem_limit_bytes(
                    block_b, n_states, hidden_dim, n_actions,
                    w1.dtype.itemsize, bufs)),
        )(*args)

    try:
        return run(single_buffer_residents=True)
    except Exception:
        # Some Pallas builds may reject Buffered(1); fall back to the default
        # double-buffered residents (costs VMEM, not correctness).
        return run(single_buffer_residents=False)


def init_actor_params(key, n_states, n_actions, hidden_dim):
    """PyTorch nn.Linear-style init: U(-1/sqrt(fan_in), 1/sqrt(fan_in)).
    Weights stored as (in_features, out_features) = PyTorch weight.T."""
    # TODO(synk): at these tiny feature dims (16/32/8) the MXU lanes are mostly
    # masked; padding hidden_dim / n_actions to 128-friendly sizes at init time
    # (zero-padded weights) would remove masked-layout overhead for free.
    ks = jax.random.split(key, 6)

    def lin(kw, kb, fan_in, fan_out):
        bound = 1.0 / jnp.sqrt(float(fan_in))
        w = jax.random.uniform(kw, (fan_in, fan_out), jnp.float32, -bound, bound)
        b = jax.random.uniform(kb, (1, fan_out), jnp.float32, -bound, bound)
        return w, b

    w1, b1 = lin(ks[0], ks[1], n_states, hidden_dim)
    w2, b2 = lin(ks[2], ks[3], hidden_dim, hidden_dim)
    w3, b3 = lin(ks[4], ks[5], hidden_dim, n_actions)
    return {"w1": w1, "b1": b1, "w2": w2, "b2": b2, "w3": w3, "b3": b3}


def actor_reference(state, params, max_action=1.0):
    hp = jax.lax.Precision.HIGHEST
    h = jnp.maximum(jnp.dot(state, params["w1"], precision=hp) + params["b1"], 0.0)
    h = jnp.maximum(jnp.dot(h, params["w2"], precision=hp) + params["b2"], 0.0)
    return max_action * jnp.tanh(jnp.dot(h, params["w3"], precision=hp)
                                 + params["b3"])


if __name__ == "__main__":
    key = jax.random.PRNGKey(0)
    k_state, k_params, k_big = jax.random.split(key, 3)

    batch, n_states, n_actions, hidden_dim = 2, 16, 8, 32
    state = jax.random.normal(k_state, (batch, n_states), jnp.float32)
    params = init_actor_params(k_params, n_states, n_actions, hidden_dim)

    # Small-batch path (gridless, fully VMEM-resident), pure f32.
    out = jax.block_until_ready(actor_forward(state, params, 1.0, use_bf16=False))
    ref = actor_reference(state, params, 1.0)
    assert out.shape == (batch, n_actions)
    assert jnp.allclose(out, ref, atol=2e-5, rtol=2e-5), "small-batch mismatch"

    # Batch-tiled path: ragged tail (1100 = 2*512 + 76), resident weights, f32.
    big_B = 1100
    big_state = jax.random.normal(k_big, (big_B, n_states), jnp.float32)
    ref_big = actor_reference(big_state, params, 2.0)
    out_big = jax.block_until_ready(
        actor_forward(big_state, params, 2.0, block_b=512, use_bf16=False))
    assert out_big.shape == ref_big.shape
    assert jnp.allclose(out_big, ref_big, atol=2e-5, rtol=2e-5), "tiled mismatch"

    # bf16 MXU inputs (weights pre-cast in the wrapper), f32 accumulate/epilogue.
    out_bf16 = jax.block_until_ready(
        actor_forward(big_state, params, 2.0, block_b=512, use_bf16=True))
    assert jnp.allclose(out_bf16, ref_big, atol=5e-2, rtol=5e-2), "bf16 mismatch"

    # Default path (auto dtype per detected TPU generation).
    out_auto = jax.block_until_ready(actor_forward(big_state, params, 2.0))
    assert jnp.allclose(out_auto, ref_big, atol=5e-2, rtol=5e-2), "auto mismatch"

    print("KERNEL_OK")
</pallas_src>

<mosaic_0001>
module attributes {stable_mosaic.version = 11 : i64} {
  func.func @_actor_kernel(%arg0: memref<2x16xf32, #tpu.memory_space<vmem>>, %arg1: memref<16x32xf32, #tpu.memory_space<vmem>>, %arg2: memref<1x32xf32, #tpu.memory_space<vmem>>, %arg3: memref<32x32xf32, #tpu.memory_space<vmem>>, %arg4: memref<1x32xf32, #tpu.memory_space<vmem>>, %arg5: memref<32x8xf32, #tpu.memory_space<vmem>>, %arg6: memref<1x8xf32, #tpu.memory_space<vmem>>, %arg7: memref<2x8xf32, #tpu.memory_space<vmem>>) attributes {dimension_semantics = [], scalar_prefetch = 0 : i64, scratch_operands = 0 : i64, tpu.core_type = #tpu.core_type<tc>} {
    %c0 = arith.constant 0 : index
    %c0_0 = arith.constant 0 : index
    %0 = vector.load %arg0[%c0, %c0_0] : memref<2x16xf32, #tpu.memory_space<vmem>>, vector<2x16xf32>
    %c0_1 = arith.constant 0 : index
    %c0_2 = arith.constant 0 : index
    %1 = vector.load %arg1[%c0_1, %c0_2] : memref<16x32xf32, #tpu.memory_space<vmem>>, vector<16x32xf32>
    %cst = arith.constant dense<0.000000e+00> : vector<2x32xf32>
    %2 = tpu.matmul %0, %1, %cst {dimension_numbers = #tpu.dot_dimension_numbers<[1], [0], [0], [1], [0, 0, 1, 1], [], []>, precision = #tpu.contract_precision<fp32>} : vector<2x16xf32>, vector<16x32xf32>, vector<2x32xf32> -> vector<2x32xf32>
    %c0_3 = arith.constant 0 : index
    %c0_4 = arith.constant 0 : index
    %3 = vector.load %arg2[%c0_3, %c0_4] : memref<1x32xf32, #tpu.memory_space<vmem>>, vector<1x32xf32>
    %4 = vector.broadcast %3 : vector<1x32xf32> to vector<2x32xf32>
    %5 = arith.addf %2, %4 : vector<2x32xf32>
    %cst_5 = arith.constant 0.000000e+00 : f32
    %6 = vector.broadcast %cst_5 : f32 to vector<2x32xf32>
    %7 = arith.maximumf %5, %6 : vector<2x32xf32>
    %c0_6 = arith.constant 0 : index
    %c0_7 = arith.constant 0 : index
    %8 = vector.load %arg3[%c0_6, %c0_7] : memref<32x32xf32, #tpu.memory_space<vmem>>, vector<32x32xf32>
    %cst_8 = arith.constant dense<0.000000e+00> : vector<2x32xf32>
    %9 = tpu.matmul %7, %8, %cst_8 {dimension_numbers = #tpu.dot_dimension_numbers<[1], [0], [0], [1], [0, 0, 1, 1], [], []>, precision = #tpu.contract_precision<fp32>} : vector<2x32xf32>, vector<32x32xf32>, vector<2x32xf32> -> vector<2x32xf32>
    %c0_9 = arith.constant 0 : index
    %c0_10 = arith.constant 0 : index
    %10 = vector.load %arg4[%c0_9, %c0_10] : memref<1x32xf32, #tpu.memory_space<vmem>>, vector<1x32xf32>
    %11 = vector.broadcast %10 : vector<1x32xf32> to vector<2x32xf32>
    %12 = arith.addf %9, %11 : vector<2x32xf32>
    %cst_11 = arith.constant 0.000000e+00 : f32
    %13 = vector.broadcast %cst_11 : f32 to vector<2x32xf32>
    %14 = arith.maximumf %12, %13 : vector<2x32xf32>
    %c0_12 = arith.constant 0 : index
    %c0_13 = arith.constant 0 : index
    %15 = vector.load %arg5[%c0_12, %c0_13] : memref<32x8xf32, #tpu.memory_space<vmem>>, vector<32x8xf32>
    %cst_14 = arith.constant dense<0.000000e+00> : vector<2x8xf32>
    %16 = tpu.matmul %14, %15, %cst_14 {dimension_numbers = #tpu.dot_dimension_numbers<[1], [0], [0], [1], [0, 0, 1, 1], [], []>, precision = #tpu.contract_precision<fp32>} : vector<2x32xf32>, vector<32x8xf32>, vector<2x8xf32> -> vector<2x8xf32>
    %c0_15 = arith.constant 0 : index
    %c0_16 = arith.constant 0 : index
    %17 = vector.load %arg6[%c0_15, %c0_16] : memref<1x8xf32, #tpu.memory_space<vmem>>, vector<1x8xf32>
    %18 = vector.broadcast %17 : vector<1x8xf32> to vector<2x8xf32>
    %19 = arith.addf %16, %18 : vector<2x8xf32>
    %20 = math.tanh %19 : vector<2x8xf32>
    %c0_17 = arith.constant 0 : index
    %c0_18 = arith.constant 0 : index
    %21 = vector.load %arg7[%c0_17, %c0_18] : memref<2x8xf32, #tpu.memory_space<vmem>>, vector<2x8xf32>
    tpu.vector_store %arg7[%c0_17, %c0_18], %20 {strides = array<i32>} : memref<2x8xf32, #tpu.memory_space<vmem>>, vector<2x8xf32>,
    return
  }
}

</mosaic_0001>

<bundles_post_ra>
// kernel: tpu_custom_call.1
= control target key start
LH: loop header
LB: loop body
LE: loop exit
PB: predicated region body
PF: predicated region fallthrough
CT: control target
= control target key end

     0   :  { %12 = vsyncpa [#allocation3], 0  ;;  %s2196_s0 = inlined_call_operand.vmem [shape: f32[2,16], index: 0, kind: input, shape index: {}]   ;;  %s2197_s1 = inlined_call_operand.vmem [shape: f32[16,32], index: 1, kind: input, shape index: {}]   ;;  %s2198_s2 = inlined_call_operand.hbm [shape: f32[1,32], index: 2, kind: input, shape index: {}]   ;;  %s2199_s3 = inlined_call_operand.vmem [shape: f32[32,32], index: 3, kind: input, shape index: {}]   ;;  %s2200_s4 = inlined_call_operand.hbm [shape: f32[1,32], index: 4, kind: input, shape index: {}]   ;;  %s2201_s5 = inlined_call_operand.vmem [shape: f32[32,8], index: 5, kind: input, shape index: {}]   ;;  %s2202_s6 = inlined_call_operand.vmem [shape: f32[1,8], index: 6, kind: input, shape index: {}]   ;;  %s2203_s7 = inlined_call_operand.hbm [shape: f32[2,8], index: 7, kind: output, shape index: {}]  }
   0x1   :  { %13 = vsyncpa [#allocation6], 0 }
   0x2   :  { %14 = vsyncpa [#allocation4], 0  ;;  %s2000_s24 = smov [#allocation2]   ;;  %s2001_s26 = smov [#allocation5]  }
   0x3   :  { %s25_s25 = sshll.u32 %s2000_s24, 4  ;;  %s37_s27 = sshll.u32 %s2001_s26, 4  ;;  %s26_s25 = int_to_ptr.vmem [resolvable:$true] %s25_s25  ;;  %s38_s27 = int_to_ptr.vmem [resolvable:$true] %s37_s27 }
   0x4   :  { %s1928_s30 = scalar_lea.hbm %s2198_s2, 16 }
   0x5   :  { %p1929_p0 = scmp.ne.s32.totalorder %s2198_s2, %s1928_s30  ;;  %p1932_p1 = scmp.lt.u32.totalorder %s1928_s30, %s2198_s2 }
   0x7   :  { %p1934_p2 = pnand %p1932_p1, %p1929_p0 }
   0x9   :  { %1937 = shalt.err (!%p1934_p2)
}
   0xa   :  { %s1938_s12 = scalar_lea.vmem %s26_s25, 16  ;;  %s1942_s13 = scalar_lea.vmem %s26_s25, 32 }
   0xb   :  { %p1939_p3 = scmp.ne.s32.totalorder %s26_s25, %s1938_s12  ;;  %p1943_p4 = scmp.lt.s32.totalorder %s26_s25, %s26_s25 }
   0xc   :  { %p1944_p5 = scmp.lt.s32.totalorder %s1942_s13, %s1938_s12 }
   0xe   :  { %p1945_p6 = por %p1944_p5, %p1943_p4 }
  0x10   :  { %p1946_p7 = pnand %p1945_p6, %p1939_p3 }
  0x12   :  { %1949 = shalt.err (!%p1946_p7)
}
  0x13   :  { %28 = dma.hbm_to_vmem [thread:$0]  %s2198_s2, 16, %s26_s25, [#allocation3]  }
  0x14   :  { %s1950_s18 = scalar_lea.hbm %s2200_s4, 16 }
  0x15   :  { %p1951_p8 = scmp.ne.s32.totalorder %s2200_s4, %s1950_s18  ;;  %p1954_p9 = scmp.lt.u32.totalorder %s1950_s18, %s2200_s4 }
  0x17   :  { %p1956_p10 = pnand %p1954_p9, %p1951_p8 }
  0x19   :  { %1959 = shalt.err (!%p1956_p10)
}
  0x1a   :  { %s1960_s23 = scalar_lea.vmem %s38_s27, 16  ;;  %s1964_s24 = scalar_lea.vmem %s38_s27, 32 }
  0x1b   :  { %p1961_p11 = scmp.ne.s32.totalorder %s38_s27, %s1960_s23  ;;  %p1965_p12 = scmp.lt.s32.totalorder %s38_s27, %s38_s27 }
  0x1c   :  { %p1966_p13 = scmp.lt.s32.totalorder %s1964_s24, %s1960_s23 }
  0x1e   :  { %p1967_p0 = por %p1966_p13, %p1965_p12 }
  0x20   :  { %p1968_p1 = pnand %p1967_p0, %p1961_p11 }
  0x22   :  { %1971 = shalt.err (!%p1968_p1)
}
  0x23   :  { %40 = dma.hbm_to_vmem [thread:$0]  %s2200_s4, 16, %s38_s27, [#allocation6]  }
  0x24   :  { %1994 = dma.done.wait [#allocation3], 16  }
  0x25   :  { %1995 = vsyncadd [#allocation3], 4294967280 }
  0x26   :  { %1996 = dma.done.wait [#allocation6], 16  }
  0x27   :  { %1997 = vsyncadd [#allocation6], 4294967280  ;;  %v2002_v0 = vmov 0.0|0.0   ;;  %vm2003_vm0 = vmmov 0   ;;  %v2004_v1 = vmov 0.0   ;;  %vm61_vm1 = vcmask 130048  }
  0x28   :  { %1802 = vmatprep.subr.bf16.mxu0 %v2002_v0  ;;  %1636 = vmatprep.mubr.msk.f32.mxu0 %vm2003_vm0, %v2004_v1  ;;  %v52_v2 = vld [vmem:[%s2197_s1] sm:$0xff]  ;;  %v53_v3 = vld [vmem:[%s2197_s1 + $0x8] sm:$0xff]  ;;  %v527_v32 = vld [vmem:[%s2199_s3 + $0x10] sm:$0xff]  ;;  %vm536_vm2 = vcmask 261120   ;;  %s2005_s22 = smov [#allocation7]   ;;  %vm1526_vm3 = vcmask 58368  }
  0x29   :  { %1799 = vmatprep.subr.bf16.mxu1 %v2002_v0  ;;  %1629 = vmatprep.mubr.msk.f32.mxu1 %vm2003_vm0, %v2004_v1  ;;  %v51_v4 = vld [vmem:[%s2196_s0] sm:$0x3]  ;;  %v66_v5 = vand.u32 4294901760, %v52_v2  ;;  %v69_v6 = vand.u32 4294901760, %v53_v3  ;;  %v526_v26 = vld [vmem:[%s2199_s3 + $0x8] sm:$0xff]  ;;  %v528_v33 = vld [vmem:[%s2199_s3 + $0x18] sm:$0xff] }
  0x2a   :  { %v63_v7 = vsel %vm61_vm1, %v51_v4, 0  ;;  %v525_v25 = vld [vmem:[%s2199_s3] sm:$0xff]  ;;  %v544_v28 = vand.u32 4294901760, %v526_v26  ;;  %v547_v34 = vand.u32 4294901760, %v527_v32  ;;  %v550_v35 = vand.u32 4294901760, %v528_v33  ;;  %s1534_s23 = sshll.u32 %s2005_s22, 4  ;;  %s1535_s23 = int_to_ptr.vmem [resolvable:$true] %s1534_s23 }
  0x2b   :  { %v132_v8 = vand.u32 4294901760, %v63_v7  ;;  %v144_v9 = vsub.f32 %v52_v2, %v66_v5  ;;  %v151_v10 = vsub.f32 %v53_v3, %v69_v6  ;;  %v1800_v11 = vpack.c.bf16 %v69_v6, %v66_v5  ;;  %v1544_v59 = vld [vmem:[#allocation2] ss:$0 sm:$0xff]  ;;  %s1972_s24 = scalar_lea.vmem %s1535_s23, 32  ;;  %p1977_p3 = scmp.lt.s32.totalorder %s1535_s23, %s1535_s23 }
  0x2c   :  { %v541_v27 = vand.u32 4294901760, %v525_v25  ;;  %v628_v31 = vsub.f32 %v526_v26, %v544_v28  ;;  %v2119_v38 = vpack.c.bf16 %v550_v35, %v547_v34  ;;  %v635_v39 = vsub.f32 %v527_v32, %v547_v34  ;;  %p1973_p2 = scmp.ne.s32.totalorder %s1535_s23, %s1972_s24  ;;  %p1978_p4 = scmp.lt.s32.totalorder %s1972_s24, %s1972_s24 }
  0x2d   :  { %v133_v12 = vsub.f32 %v63_v7, %v132_v8  ;;  %v145_v13 = vand.u32 4294901760, %v144_v9  ;;  %v152_v14 = vand.u32 4294901760, %v151_v10  ;;  %1801 = vmatpush3.bf16.msra.mxu1 %v1800_v11  ;;  %v1806_v23 = vpack.c.bf16 %v151_v10, %v144_v9 }
  0x2e   :  { %1817 = vmatprep.subr.bf16.mxu1 %v2002_v0  ;;  %v2109_v29 = vpack.c.bf16 %v544_v28, %v541_v27  ;;  %v621_v30 = vsub.f32 %v525_v25, %v541_v27  ;;  %v629_v37 = vand.u32 4294901760, %v628_v31  ;;  %v642_v40 = vsub.f32 %v528_v33, %v550_v35  ;;  %p1979_p5 = por %p1978_p4, %p1977_p3 }
  0x2f   :  { %v134_v15 = vand.u32 4294901760, %v133_v12  ;;  %v146_v16 = vsub.f32 %v144_v9, %v145_v13  ;;  %v153_v17 = vsub.f32 %v151_v10, %v152_v14  ;;  %v1812_v24 = vpack.c.bf16 %v152_v14, %v145_v13  ;;  %v1026_v9 = vld [vmem:[%s2201_s5] sm:$0xff]  ;;  %v1027_v10 = vld [vmem:[%s2201_s5 + $0x8] sm:$0xff] }
  0x30   :  { %v622_v36 = vand.u32 4294901760, %v621_v30  ;;  %v630_v42 = vsub.f32 %v628_v31, %v629_v37  ;;  %v636_v44 = vand.u32 4294901760, %v635_v39  ;;  %v643_v45 = vand.u32 4294901760, %v642_v40  ;;  %p1980_p6 = pnand %p1979_p5, %p1973_p2 }
  0x31   :  { %v135_v18 = vsub.f32 %v133_v12, %v134_v15  ;;  %v147_v19 = vand.u32 4294901760, %v146_v16  ;;  %v154_v20 = vand.u32 4294901760, %v153_v17  ;;  %v1830_v53 = vpack.c.bf16 %v628_v31, %v621_v30  ;;  %v1029_v16 = vld [vmem:[%s2201_s5 + $0x18] sm:$0xff] }
  0x32   :  { %v623_v41 = vsub.f32 %v621_v30, %v622_v36  ;;  %v631_v46 = vand.u32 4294901760, %v630_v42  ;;  %v637_v47 = vsub.f32 %v635_v39, %v636_v44  ;;  %v644_v48 = vsub.f32 %v642_v40, %v643_v45 }
  0x33   :  { %v136_v21 = vand.u32 4294901760, %v135_v18  ;;  %v1803_v22 = vpack.c.bf16 %v154_v20, %v147_v19  ;;  %v1833_v54 = vpack.c.bf16 %v642_v40, %v635_v39  ;;  %v1842_v55 = vpack.c.bf16 %v629_v37, %v622_v36 }
  0x34   :  { %v624_v43 = vand.u32 4294901760, %v623_v41  ;;  %v638_v50 = vand.u32 4294901760, %v637_v47  ;;  %v645_v51 = vand.u32 4294901760, %v644_v48  ;;  %v1845_v56 = vpack.c.bf16 %v643_v45, %v636_v44  ;;  %v1545_v41 = vld [vmem:[#allocation5] ss:$0 sm:$0xff] }
  0x35   :  { %1630 = vmatmul.mubr.f32.vlgmr.msra.gmra.mrb[0].mxu1 %v136_v21  ;;  %1804 = vmatpush3.bf16.msra.mxu0 %v1803_v22  ;;  %v1050_v20 = vand.u32 4294901760, %v1029_v16 }
  0x36   :  { %1675 = vmatprep.mubr.msk.f32.mxu1 %vm2003_vm0, %v2004_v1  ;;  %1805 = vmatprep.subr.bf16.mxu0 %v2002_v0  ;;  %v1824_v49 = vpack.c.bf16 %v631_v46, %v624_v43  ;;  %v1827_v52 = vpack.c.bf16 %v645_v51, %v638_v50 }
  0x37   :  { %1819 = vmatpush3.bf16.msra.mxu1 %v2109_v29 }
  0x38   :  { %1637 = vmatmul.mubr.f32.vlgmr.msra.gmra.mrb[0].mxu0 %v132_v8  ;;  %1820 = vmatprep.subr.bf16.mxu1 %v2002_v0 }
  0x39   :  { %1807 = vmatpush3.bf16.msra.mxu0 %v1806_v23  ;;  %1643 = vmatprep.mubr.msk.f32.mxu0 %vm2003_vm0, %v2004_v1 }
  0x3a   :  { %1808 = vmatprep.subr.bf16.mxu0 %v2002_v0 }
  0x3b   :  { %1822 = vmatpush3.bf16.msra.mxu1 %v2119_v38 }
  0x3c   :  { %1823 = vmatprep.subr.bf16.mxu1 %v2002_v0 }
  0x40   :  { %1644 = vmatmul.mubr.f32.vlgmr.msra.gmra.mrb[0].mxu0 %v133_v12  ;;  %v1044_v12 = vand.u32 4294901760, %v1027_v10 }
  0x41   :  { %1810 = vmatpush3.bf16.msra.mxu0 %v1800_v11  ;;  %1650 = vmatprep.mubr.msk.f32.mxu0 %vm2003_vm0, %v2004_v1 }
  0x42   :  { %1811 = vmatprep.subr.bf16.mxu0 %v2002_v0  ;;  %v1128_v14 = vsub.f32 %v1027_v10, %v1044_v12 }
  0x44   :  { %v1129_v18 = vand.u32 4294901760, %v1128_v14 }
  0x46   :  { %v1130_v22 = vsub.f32 %v1128_v14, %v1129_v18 }
  0x48   :  { %1651 = vmatmul.mubr.f32.vlgmr.msra.gmra.mrb[0].mxu0 %v134_v15  ;;  %v1028_v15 = vld [vmem:[%s2201_s5 + $0x10] sm:$0xff]  ;;  %v1131_v26 = vand.u32 4294901760, %v1130_v22 }
  0x49   :  { %1813 = vmatpush3.bf16.msra.mxu0 %v1812_v24  ;;  %1657 = vmatprep.mubr.msk.f32.mxu0 %vm2003_vm0, %v2004_v1  ;;  %v1047_v19 = vand.u32 4294901760, %v1028_v15  ;;  %v1142_v24 = vsub.f32 %v1029_v16, %v1050_v20 }
  0x4a   :  { %1814 = vmatprep.subr.bf16.mxu0 %v2002_v0 }
  0x4b   :  { %v1135_v23 = vsub.f32 %v1028_v15, %v1047_v19  ;;  %v1143_v28 = vand.u32 4294901760, %v1142_v24  ;;  %v1857_v37 = vpack.c.bf16 %v1050_v20, %v1047_v19 }
  0x4d   :  { %v1136_v27 = vand.u32 4294901760, %v1135_v23  ;;  %v1144_v31 = vsub.f32 %v1142_v24, %v1143_v28 }
  0x4f   :  { %v1137_v30 = vsub.f32 %v1135_v23, %v1136_v27  ;;  %v1145_v33 = vand.u32 4294901760, %v1144_v31  ;;  %v1881_v40 = vpack.c.bf16 %v1143_v28, %v1136_v27 }
  0x50   :  { %1658 = vmatmul.mubr.f32.vlgmr.msra.gmra.mrb[0].mxu0 %v132_v8 }
  0x51   :  { %1816 = vmatpush3.bf16.msra.mxu0 %v1800_v11  ;;  %1664 = vmatprep.mubr.msk.f32.mxu0 %vm2003_vm0, %v2004_v1  ;;  %v1041_v11 = vand.u32 4294901760, %v1026_v9  ;;  %v1138_v32 = vand.u32 4294901760, %v1137_v30 }
  0x52   :  { %1859 = vmatprep.subr.bf16.mxu0 %v2002_v0 }
  0x53   :  { %v1121_v13 = vsub.f32 %v1026_v9, %v1041_v11  ;;  %v1863_v34 = vpack.c.bf16 %v1145_v33, %v1138_v32  ;;  %v1854_v35 = vpack.c.bf16 %v1044_v12, %v1041_v11 }
  0x55   :  { %v1122_v17 = vand.u32 4294901760, %v1121_v13  ;;  %v1866_v36 = vpack.c.bf16 %v1128_v14, %v1121_v13 }
  0x57   :  { %v1123_v21 = vsub.f32 %v1121_v13, %v1122_v17  ;;  %v1878_v39 = vpack.c.bf16 %v1129_v18, %v1122_v17 }
  0x58   :  { %1665 = vmatmul.mubr.f32.vlgmr.msra.gmra.mrb[0].mxu0 %v132_v8 }
  0x59   :  { %1752 = vmatprep.mubr.msk.f32.mxu0 %vm2003_vm0, %v2004_v1  ;;  %v1124_v25 = vand.u32 4294901760, %v1123_v21 }
 0x108   :  { %v138_v57 = vpop.f32.mrb[0].mxu1 }
 0x109   :  { %v1631_v58 = vpop.f32.mrb[1].mxu1  ;;  %v139_v60 = vadd.f32 %v1544_v59, %v138_v57 }
 0x12b   :  { %v520_v61 = vpop.f32.mrb[0].mxu0 }
 0x12c   :  { %v1890_v62 = vadd.f32 %v520_v61, %v139_v60  ;;  %v1666_v63 = vpop.f32.mrb[1].mxu0 }
 0x12e   :  { %v524_v2 = vmax.f32 %v1890_v62, 0.0 }
 0x130   :  { %v538_v3 = vsel %vm536_vm2, %v524_v2, 0 }
 0x131   :  { %v609_v4 = vand.u32 4294901760, %v538_v3 }
 0x133   :  { %v610_v5 = vsub.f32 %v538_v3, %v609_v4 }
 0x135   :  { %v611_v6 = vand.u32 4294901760, %v610_v5 }
 0x137   :  { %v612_v7 = vsub.f32 %v610_v5, %v611_v6 }
 0x139   :  { %v613_v8 = vand.u32 4294901760, %v612_v7 }
 0x13b   :  { %1676 = vmatmul.mubr.f32.vlgmr.msra.gmra.mrb[2].mxu1 %v613_v8 }
 0x13c   :  { %1825 = vmatpush3.bf16.msra.mxu1 %v1824_v49  ;;  %1686 = vmatprep.mubr.msk.f32.mxu1 %vm2003_vm0, %v2004_v1 }
 0x13d   :  { %1826 = vmatprep.subr.bf16.mxu1 %v2002_v0 }
 0x140   :  { %1828 = vmatpush3.bf16.msra.mxu1 %v1827_v52 }
 0x141   :  { %1829 = vmatprep.subr.bf16.mxu1 %v2002_v0 }
 0x143   :  { %1687 = vmatmul.mubr.f32.vlgmr.msra.gmra.mrb[2].mxu1 %v609_v4 }
 0x144   :  { %1831 = vmatpush3.bf16.msra.mxu1 %v1830_v53  ;;  %1697 = vmatprep.mubr.msk.f32.mxu1 %vm2003_vm0, %v2004_v1 }
 0x145   :  { %1832 = vmatprep.subr.bf16.mxu1 %v2002_v0 }
 0x148   :  { %1834 = vmatpush3.bf16.msra.mxu1 %v1833_v54  ;;  %v1546_v54 = vld [vmem:[%s2202_s6] ss:$0 sm:$0xff] }
 0x149   :  { %1835 = vmatprep.subr.bf16.mxu1 %v2002_v0 }
 0x14b   :  { %1698 = vmatmul.mubr.f32.vlgmr.msra.gmra.mrb[2].mxu1 %v610_v5 }
 0x14c   :  { %1837 = vmatpush3.bf16.msra.mxu1 %v2109_v29  ;;  %1708 = vmatprep.mubr.msk.f32.mxu1 %vm2003_vm0, %v2004_v1 }
 0x14d   :  { %1838 = vmatprep.subr.bf16.mxu1 %v2002_v0 }
 0x150   :  { %1840 = vmatpush3.bf16.msra.mxu1 %v2119_v38 }
 0x151   :  { %1841 = vmatprep.subr.bf16.mxu1 %v2002_v0 }
 0x153   :  { %1709 = vmatmul.mubr.f32.vlgmr.msra.gmra.mrb[2].mxu1 %v611_v6 }
 0x154   :  { %1843 = vmatpush3.bf16.msra.mxu1 %v1842_v55  ;;  %1719 = vmatprep.mubr.msk.f32.mxu1 %vm2003_vm0, %v2004_v1 }
 0x155   :  { %1844 = vmatprep.subr.bf16.mxu1 %v2002_v0 }
 0x158   :  { %1846 = vmatpush3.bf16.msra.mxu1 %v1845_v56 }
 0x159   :  { %1847 = vmatprep.subr.bf16.mxu1 %v2002_v0 }
 0x15b   :  { %1720 = vmatmul.mubr.f32.vlgmr.msra.gmra.mrb[2].mxu1 %v609_v4 }
 0x15c   :  { %1849 = vmatpush3.bf16.msra.mxu1 %v2109_v29  ;;  %1730 = vmatprep.mubr.msk.f32.mxu1 %vm2003_vm0, %v2004_v1  ;;  %v1860_v29 = vpack.c.bf16 %v1131_v26, %v1124_v25 }
 0x15d   :  { %1850 = vmatprep.subr.bf16.mxu1 %v2002_v0 }
 0x15e   :  { %1861 = vmatpush3.bf16.msra.mxu0 %v1860_v29 }
 0x15f   :  { %1862 = vmatprep.subr.bf16.mxu0 %v2002_v0 }
 0x160   :  { %1852 = vmatpush3.bf16.msra.mxu1 %v2119_v38  ;;  %v1869_v38 = vpack.c.bf16 %v1142_v24, %v1135_v23 }
 0x161   :  { %1853 = vmatprep.subr.bf16.mxu1 %v2002_v0 }
 0x162   :  { %1864 = vmatpush3.bf16.msra.mxu0 %v1863_v34 }
 0x163   :  { %1731 = vmatmul.mubr.f32.vlgmr.msra.gmra.mrb[2].mxu1 %v609_v4  ;;  %1865 = vmatprep.subr.bf16.mxu0 %v2002_v0 }
 0x164   :  { %1741 = vmatprep.mubr.msk.f32.mxu1 %vm2003_vm0, %v2004_v1  ;;  %1855 = vmatpush3.bf16.msra.mxu1 %v1854_v35 }
 0x165   :  { %1856 = vmatprep.subr.bf16.mxu1 %v2002_v0 }
 0x168   :  { %1858 = vmatpush3.bf16.msra.mxu1 %v1857_v37 }
 0x236   :  { %v1021_v42 = vpop.f32.mrb[2].mxu1 }
 0x237   :  { %v1891_v43 = vadd.f32 %v1545_v41, %v1021_v42  ;;  %v1732_v44 = vpop.f32.mrb[3].mxu1 }
 0x239   :  { %v1025_v45 = vmax.f32 %v1891_v43, 0.0 }
 0x23b   :  { %v1038_v46 = vsel %vm536_vm2, %v1025_v45, 0 }
 0x23c   :  { %v1109_v47 = vand.u32 4294901760, %v1038_v46 }
 0x23e   :  { %v1110_v48 = vsub.f32 %v1038_v46, %v1109_v47  ;;  %1753 = vmatmul.mubr.f32.vlgmr.msra.gmra.mrb[2].mxu0 %v1109_v47 }
 0x23f   :  { %1867 = vmatpush3.bf16.msra.mxu0 %v1866_v36  ;;  %1763 = vmatprep.mubr.msk.f32.mxu0 %vm2003_vm0, %v2004_v1 }
 0x240   :  { %v1111_v49 = vand.u32 4294901760, %v1110_v48  ;;  %1868 = vmatprep.subr.bf16.mxu0 %v2002_v0 }
 0x242   :  { %v1112_v50 = vsub.f32 %v1110_v48, %v1111_v49 }
 0x243   :  { %1870 = vmatpush3.bf16.msra.mxu0 %v1869_v38 }
 0x244   :  { %v1113_v51 = vand.u32 4294901760, %v1112_v50  ;;  %1871 = vmatprep.subr.bf16.mxu0 %v2002_v0 }
 0x246   :  { %1742 = vmatmul.mubr.f32.vlgmr.msra.gmra.mrb[4].mxu1 %v1113_v51  ;;  %1764 = vmatmul.mubr.f32.vlgmr.msra.gmra.mrb[2].mxu0 %v1110_v48 }
 0x247   :  { %1873 = vmatpush3.bf16.msra.mxu0 %v1854_v35  ;;  %1774 = vmatprep.mubr.msk.f32.mxu0 %vm2003_vm0, %v2004_v1 }
 0x248   :  { %1874 = vmatprep.subr.bf16.mxu0 %v2002_v0 }
 0x24b   :  { %1876 = vmatpush3.bf16.msra.mxu0 %v1857_v37 }
 0x24c   :  { %1877 = vmatprep.subr.bf16.mxu0 %v2002_v0 }
 0x24e   :  { %1775 = vmatmul.mubr.f32.vlgmr.msra.gmra.mrb[2].mxu0 %v1111_v49 }
 0x24f   :  { %1879 = vmatpush3.bf16.msra.mxu0 %v1878_v39  ;;  %1785 = vmatprep.mubr.msk.f32.mxu0 %vm2003_vm0, %v2004_v1 }
 0x250   :  { %1880 = vmatprep.subr.bf16.mxu0 %v2002_v0 }
 0x253   :  { %1882 = vmatpush3.bf16.msra.mxu0 %v1881_v40 }
 0x254   :  { %1883 = vmatprep.subr.bf16.mxu0 %v2002_v0 }
 0x256   :  { %1786 = vmatmul.mubr.f32.vlgmr.msra.gmra.mrb[2].mxu0 %v1109_v47 }
 0x257   :  { %1885 = vmatpush3.bf16.msra.mxu0 %v1854_v35  ;;  %1796 = vmatprep.mubr.msk.f32.mxu0 %vm2003_vm0, %v2004_v1 }
 0x258   :  { %1886 = vmatprep.subr.bf16.mxu0 %v2002_v0 }
 0x25b   :  { %1888 = vmatpush3.bf16.msra.mxu0 %v1857_v37 }
 0x25e   :  { %1797 = vmatmul.mubr.f32.vlgmr.msra.gmra.mrb[2].mxu0 %v1109_v47 }
 0x319   :  { %v1115_v52 = vpop.f32.mrb[4].mxu1 }
 0x31a   :  { %v1743_v53 = vpop.f32.mrb[5].mxu1  ;;  %v1116_v55 = vadd.f32 %v1546_v54, %v1115_v52 }
 0x331   :  { %v1521_v56 = vpop.f32.mrb[2].mxu0 }
 0x332   :  { %v1893_v57 = vadd.f32 %v1521_v56, %v1116_v55  ;;  %v1798_v58 = vpop.f32.mrb[3].mxu0 }
 0x334   :  { %1926 = vtanh.f32 %v1893_v57 }
 0x33e   :  { %v1927_v1 = vpop.eup %1926 }
 0x33f   :  { %1527 = vst.msk [vmem:[#allocation7] sm:$0x3] %vm1526_vm3, %v1927_v1 }
 0x340   :  { %1983 = shalt.err (!%p1980_p6)
}
 0x341   :  { %s1984_s25 = scalar_lea.hbm %s2203_s7, 32 }
 0x342   :  { %p1985_p7 = scmp.ne.s32.totalorder %s2203_s7, %s1984_s25  ;;  %p1988_p8 = scmp.lt.u32.totalorder %s1984_s25, %s2203_s7 }
 0x344   :  { %p1990_p9 = pnand %p1988_p8, %p1985_p7 }
 0x346   :  { %1993 = shalt.err (!%p1990_p9)
}
 0x347   :  { %1537 = dma.vmem_to_hbm [thread:$0]  %s1535_s23, 32, %s2203_s7, [#allocation4]  }
 0x348   :  { %1998 = dma.done.wait [#allocation4], 32  }
 0x349   :  { %1999 = vsyncadd [#allocation4], 4294967264 }
 0x34a   :  { %1541 = vsyncpa [#allocation3], 1 }
 0x34b   :  { %1542 = vsyncpa [#allocation6], 1 }
 0x34c   :  { %1543 = vsyncpa [#allocation4], 1 }

</bundles_post_ra>
